<compile_context>
chip_gen: v7x
topology: tpu7x:2x2x1
jax: 0.10.0
libtpu: 0.0.40
codegen_flags: <defaults>
</compile_context>

<pallas_src>
import functools

import jax
import jax.numpy as jnp
from jax import lax
from jax.experimental import pallas as pl
from jax.experimental.pallas import tpu as pltpu

# ----------------------------- configuration ------------------------------
BATCH = 64               # small, TPU-friendly example batch
INPUT_SIZE = 64          # == backcast_size (residual - backcast must be valid)
BACKCAST = 64
HORIZON = 32
HIDDEN = 64
N_LAYERS = 2             # layers in the per-block FC stack (hard-coded below)
N_BLOCKS = 3
PACK = 128               # packed lane width: [backcast | forecast | zero pad]

assert BACKCAST + HORIZON <= PACK
assert INPUT_SIZE == BACKCAST


# ------------------------------ Pallas kernel ------------------------------
def nbeats_stack_kernel(
    # VMEM inputs
    x_ref,       # (TB, INPUT_SIZE)  raw input window (unpadded)
    w1_ref,      # (PACK, HIDDEN)    FC layer 1 weight, rows >= INPUT_SIZE zero, compute_dtype
    w2_ref,      # (HIDDEN, HIDDEN)  FC layer 2 weight, compute_dtype
    wh_ref,      # (HIDDEN, PACK)    packed head weight [wb*basis_b | wf*basis_f | 0], compute_dtype
    bias_ref,    # (8, PACK) f32     row0[:H]=b1, row1[:H]=b2, row2=[bb*basis_b+b_b | bf*basis_f+b_f | 0]
    # VMEM output
    out_ref,     # (TB, PACK)        [last backcast | stack forecast | 0]
    *,
    n_blocks,
    backcast,
    hidden,
    compute_dtype,
):
    tb = x_ref.shape[0]
    pack = out_ref.shape[1]
    f32 = jnp.float32

    # ---- hoisted loads (the block loop is unrolled; load weights once) ----
    w1 = w1_ref[...]
    w2 = w2_ref[...]
    wh = wh_ref[...]
    bias = bias_ref[...]

    # pre-broadcast bias rows ONCE (broadcast_in_dim is not CSE'd across the
    # unrolled iterations)
    b1 = jnp.broadcast_to(bias[0:1, :hidden], (tb, hidden))
    b2 = jnp.broadcast_to(bias[1:2, :hidden], (tb, hidden))
    bh = jnp.broadcast_to(bias[2:3, :], (tb, pack))

    # lane mask: True for backcast lanes [0, backcast)
    lane = lax.broadcasted_iota(jnp.int32, (1, pack), 1)
    is_bc = lane < backcast
    bc_mask = is_bc.astype(f32)

    # pack the residual to 128 lanes once; lanes >= backcast stay exactly zero
    x = x_ref[...].astype(f32)
    residual = jnp.concatenate(
        [x, jnp.zeros((tb, pack - x.shape[1]), f32)], axis=1)

    acc = jnp.zeros((tb, pack), f32)   # packed stack-forecast accumulator
    bf = acc                           # packed per-block [backcast|forecast]

    for _ in range(n_blocks):
        # FC stack (Linear + ReLU, 2 layers).  Weights already in compute_dtype;
        # activations optionally bf16 on the MXU, accumulation + VPU math f32.
        h = jnp.dot(residual.astype(compute_dtype), w1,
                    preferred_element_type=f32)
        h = jnp.maximum(h + b1, 0.0)
        h = jnp.dot(h.astype(compute_dtype), w2,
                    preferred_element_type=f32)
        h = jnp.maximum(h + b2, 0.0)

        # fused theta heads with the generic basis folded in:
        #   lanes [0,backcast)   -> backcast = theta_b*basis_b + b_b
        #   lanes [backcast,..)  -> forecast = theta_f*basis_f + b_f
        bf = jnp.dot(h.astype(compute_dtype), wh,
                     preferred_element_type=f32) + bh

        acc = acc + bf                       # forecast lanes accumulate
        residual = residual - bf * bc_mask   # only backcast lanes update residual

    # Packed output slab: last backcast in lanes [0,backcast),
    # stack forecast in lanes [backcast, backcast+horizon), zeros beyond.
    out_ref[...] = jnp.where(is_bc, bf, acc)


# ------------------------------ wrapper -----------------------------------
def nbeats_stack(x, params, n_blocks=N_BLOCKS, grid_splits=1,
                 compute_dtype=jnp.float32):
    """Returns (stack_forecast (B,HORIZON), last_backcast (B,BACKCAST)).

    grid_splits: 1 for single-TC chips (v5e/v6e); 2 on v7x so both
    TensorCores get a batch shard.
    """
    (w1, b1, w2, b2, wb, bb, wf, bf_, basis_b, basis_f, basis_bb, basis_bf) = params
    B, in_size = x.shape
    f32 = jnp.float32
    BF_END = BACKCAST + HORIZON

    if grid_splits < 1 or B % grid_splits != 0 or (B // grid_splits) % 8 != 0:
        grid_splits = 1
    tb = B // grid_splits

    # ---- wrapper-side packing / exact algebraic folds (no kernel compute) ----
    # FC layer 1 weight zero-padded to 128 input lanes (residual is packed).
    w1_p = jnp.zeros((PACK, HIDDEN), f32).at[:in_size, :].set(w1.astype(f32))

    # Fused theta head with the generic basis scale folded into the columns.
    wh = jnp.zeros((HIDDEN, PACK), f32)
    wh = wh.at[:, :BACKCAST].set(wb.astype(f32) * basis_b)
    wh = wh.at[:, BACKCAST:BF_END].set(wf.astype(f32) * basis_f)

    # Folded head bias: bh' = theta_bias * basis_scale + basis_bias.
    bh = jnp.zeros((PACK,), f32)
    bh = bh.at[:BACKCAST].set(bb.astype(f32) * basis_b + basis_bb)
    bh = bh.at[BACKCAST:BF_END].set(bf_.astype(f32) * basis_f + basis_bf)

    # All (1, ·) bias rows consolidated into one (8, 128) slab -> one DMA.
    bias_slab = jnp.zeros((8, PACK), f32)
    bias_slab = bias_slab.at[0, :HIDDEN].set(b1.astype(f32))
    bias_slab = bias_slab.at[1, :HIDDEN].set(b2.astype(f32))
    bias_slab = bias_slab.at[2, :].set(bh)

    # Pre-cast matmul weights once (no per-unrolled-iteration converts in-kernel;
    # halves weight DMA bytes in bf16 mode).
    w1_p = w1_p.astype(compute_dtype)
    w2_p = w2.astype(compute_dtype)
    wh_p = wh.astype(compute_dtype)

    grid = (grid_splits,)
    in_specs = [
        pl.BlockSpec((tb, in_size), lambda i: (i, 0)),     # x (batch-tiled, unpadded)
        pl.BlockSpec((PACK, HIDDEN), lambda i: (0, 0)),    # w1 (padded, compute_dtype)
        pl.BlockSpec((HIDDEN, HIDDEN), lambda i: (0, 0)),  # w2
        pl.BlockSpec((HIDDEN, PACK), lambda i: (0, 0)),    # packed/folded head weight
        pl.BlockSpec((8, PACK), lambda i: (0, 0)),         # consolidated bias slab
    ]
    out_specs = pl.BlockSpec((tb, PACK), lambda i: (i, 0))

    # Advisory cost hint so XLA can overlap this tiny custom call.
    wbytes = jnp.dtype(compute_dtype).itemsize
    flops = n_blocks * B * 2 * (PACK * HIDDEN + HIDDEN * HIDDEN + HIDDEN * PACK)
    bytes_accessed = (4 * (B * in_size + B * PACK + 8 * PACK)
                      + wbytes * (PACK * HIDDEN + HIDDEN * HIDDEN + HIDDEN * PACK))
    cost = pl.CostEstimate(flops=flops, transcendentals=0,
                           bytes_accessed=bytes_accessed)

    kernel = functools.partial(nbeats_stack_kernel, n_blocks=n_blocks,
                               backcast=BACKCAST, hidden=HIDDEN,
                               compute_dtype=compute_dtype)

    out = pl.pallas_call(
        kernel,
        out_shape=jax.ShapeDtypeStruct((B, PACK), f32),
        grid_spec=pltpu.PrefetchScalarGridSpec(
            num_scalar_prefetch=0,
            grid=grid,
            in_specs=in_specs,
            out_specs=out_specs,
        ),
        compiler_params=pltpu.CompilerParams(
            dimension_semantics=("parallel",)),   # batch shards across TCs on v7x
        cost_estimate=cost,
    )(x, w1_p, w2_p, wh_p, bias_slab)

    stack_forecast = out[:, BACKCAST:BF_END]   # (B, HORIZON)
    last_backcast = out[:, :BACKCAST]          # (B, BACKCAST)
    return stack_forecast, last_backcast


# ------------------------- deterministic parameters ------------------------
def init_params(key):
    def kaiming(key, fan_in, fan_out):
        # kaiming_normal_, mode='fan_in', nonlinearity='relu' -> std = sqrt(2/fan_in)
        std = (2.0 / fan_in) ** 0.5
        return jax.random.normal(key, (fan_in, fan_out), jnp.float32) * std

    keys = jax.random.split(key, 4)
    w1 = kaiming(keys[0], INPUT_SIZE, HIDDEN)       # stored pre-transposed [in, out]
    b1 = jnp.zeros((HIDDEN,), jnp.float32)
    w2 = kaiming(keys[1], HIDDEN, HIDDEN)
    b2 = jnp.zeros((HIDDEN,), jnp.float32)
    wb = kaiming(keys[2], HIDDEN, BACKCAST)         # theta_b head
    bb = jnp.zeros((BACKCAST,), jnp.float32)
    wf = kaiming(keys[3], HIDDEN, HORIZON)          # theta_f head
    bf = jnp.zeros((HORIZON,), jnp.float32)
    # generic_basis parameters
    basis_b = jnp.float32(0.01)
    basis_f = jnp.float32(0.01)
    basis_bb = jnp.zeros((BACKCAST,), jnp.float32)  # b_b
    basis_bf = jnp.zeros((HORIZON,), jnp.float32)   # b_f
    return (w1, b1, w2, b2, wb, bb, wf, bf, basis_b, basis_f, basis_bb, basis_bf)


# ------------------------------ pure-JAX ref --------------------------------
def nbeats_stack_ref(x, params, n_blocks=N_BLOCKS):
    (w1, b1, w2, b2, wb, bb, wf, bf, basis_b, basis_f, basis_bb, basis_bf) = params
    residual = x
    stack_forecast = jnp.zeros((x.shape[0], HORIZON), jnp.float32)
    backcast = None
    for _ in range(n_blocks):
        h = jnp.maximum(residual @ w1 + b1, 0.0)
        h = jnp.maximum(h @ w2 + b2, 0.0)
        theta_b = h @ wb + bb
        theta_f = h @ wf + bf
        backcast = theta_b * basis_b + basis_bb
        forecast = theta_f * basis_f + basis_bf
        stack_forecast = stack_forecast + forecast
        residual = residual - backcast
    return stack_forecast, backcast


# --------------------------------- main ------------------------------------
if __name__ == "__main__":
    key = jax.random.PRNGKey(0)
    k_x, k_p = jax.random.split(key)

    x = jax.random.normal(k_x, (BATCH, INPUT_SIZE), jnp.float32)
    params = init_params(k_p)

    fc, bc = jax.jit(nbeats_stack)(x, params)
    jax.block_until_ready((fc, bc))

    fc_ref, bc_ref = nbeats_stack_ref(x, params)
    assert fc.shape == (BATCH, HORIZON) and bc.shape == (BATCH, BACKCAST)
    assert jnp.allclose(fc, fc_ref, atol=1e-3, rtol=1e-3), \
        float(jnp.max(jnp.abs(fc - fc_ref)))
    assert jnp.allclose(bc, bc_ref, atol=1e-3, rtol=1e-3), \
        float(jnp.max(jnp.abs(bc - bc_ref)))

    # NOTE: pass compute_dtype=jnp.bfloat16 for bf16 MXU inputs (f32 accumulation
    # and f32 elementwise math, safe on v5e/v6e/v7x); validate that path against a
    # bf16 reference / wider tolerance.  On v7x pass grid_splits=2 so both
    # TensorCores get a batch shard.
    print("KERNEL_OK")
</pallas_src>

<mosaic_0001>
module attributes {stable_mosaic.version = 11 : i64} {
  func.func @nbeats_stack_kernel(%arg0: i32, %arg1: memref<64x64xf32, #tpu.memory_space<vmem>>, %arg2: memref<128x64xf32, #tpu.memory_space<vmem>>, %arg3: memref<64x64xf32, #tpu.memory_space<vmem>>, %arg4: memref<64x128xf32, #tpu.memory_space<vmem>>, %arg5: memref<8x128xf32, #tpu.memory_space<vmem>>, %arg6: memref<64x128xf32, #tpu.memory_space<vmem>>) attributes {dimension_semantics = [#tpu.dimension_semantics<parallel>], iteration_bounds = array<i64: 1>, scalar_prefetch = 0 : i64, scratch_operands = 0 : i64, tpu.core_type = #tpu.core_type<tc>, window_params = [{transform_indices = @transform_0, window_bounds = array<i64: 64, 64>}, {pipeline_mode = #tpu.pipeline_mode<synchronous>, transform_indices = @transform_1, window_bounds = array<i64: 128, 64>}, {pipeline_mode = #tpu.pipeline_mode<synchronous>, transform_indices = @transform_2, window_bounds = array<i64: 64, 64>}, {pipeline_mode = #tpu.pipeline_mode<synchronous>, transform_indices = @transform_3, window_bounds = array<i64: 64, 128>}, {pipeline_mode = #tpu.pipeline_mode<synchronous>, transform_indices = @transform_4, window_bounds = array<i64: 8, 128>}, {transform_indices = @transform_5, window_bounds = array<i64: 64, 128>}]} {
    %c0 = arith.constant 0 : index
    %c0_0 = arith.constant 0 : index
    %0 = vector.load %arg2[%c0, %c0_0] : memref<128x64xf32, #tpu.memory_space<vmem>>, vector<128x64xf32>
    %c0_1 = arith.constant 0 : index
    %c0_2 = arith.constant 0 : index
    %1 = vector.load %arg3[%c0_1, %c0_2] : memref<64x64xf32, #tpu.memory_space<vmem>>, vector<64x64xf32>
    %c0_3 = arith.constant 0 : index
    %c0_4 = arith.constant 0 : index
    %2 = vector.load %arg4[%c0_3, %c0_4] : memref<64x128xf32, #tpu.memory_space<vmem>>, vector<64x128xf32>
    %c0_5 = arith.constant 0 : index
    %c0_6 = arith.constant 0 : index
    %3 = vector.load %arg5[%c0_5, %c0_6] : memref<8x128xf32, #tpu.memory_space<vmem>>, vector<8x128xf32>
    %4 = vector.extract_strided_slice %3 {offsets = [0, 0], sizes = [1, 64], strides = [1, 1]} : vector<8x128xf32> to vector<1x64xf32>
    %5 = vector.shape_cast %4 : vector<1x64xf32> to vector<1x64xf32>
    %6 = vector.broadcast %5 : vector<1x64xf32> to vector<64x64xf32>
    %7 = vector.extract_strided_slice %3 {offsets = [1, 0], sizes = [1, 64], strides = [1, 1]} : vector<8x128xf32> to vector<1x64xf32>
    %8 = vector.shape_cast %7 : vector<1x64xf32> to vector<1x64xf32>
    %9 = vector.broadcast %8 : vector<1x64xf32> to vector<64x64xf32>
    %10 = vector.extract_strided_slice %3 {offsets = [2, 0], sizes = [1, 128], strides = [1, 1]} : vector<8x128xf32> to vector<1x128xf32>
    %11 = vector.shape_cast %10 : vector<1x128xf32> to vector<1x128xf32>
    %12 = vector.broadcast %11 : vector<1x128xf32> to vector<64x128xf32>
    %13 = tpu.iota {dimensions = array<i32: 1>} : vector<1x128xi32>
    %c64_i32 = arith.constant 64 : i32
    %14 = vector.broadcast %c64_i32 : i32 to vector<1x128xi32>
    %15 = arith.cmpi slt, %13, %14 : vector<1x128xi32>
    %16 = arith.extui %15 : vector<1x128xi1> to vector<1x128xi32>
    %17 = arith.sitofp %16 : vector<1x128xi32> to vector<1x128xf32>
    %c0_7 = arith.constant 0 : index
    %c0_8 = arith.constant 0 : index
    %18 = vector.load %arg1[%c0_7, %c0_8] : memref<64x64xf32, #tpu.memory_space<vmem>>, vector<64x64xf32>
    %cst = arith.constant 0.000000e+00 : f32
    %19 = vector.broadcast %cst : f32 to vector<64x64xf32>
    %20 = tpu.concatenate %18, %19 in 1 : vector<64x64xf32>, vector<64x64xf32> -> vector<64x128xf32>
    %cst_9 = arith.constant 0.000000e+00 : f32
    %21 = vector.broadcast %cst_9 : f32 to vector<64x128xf32>
    %cst_10 = arith.constant dense<0.000000e+00> : vector<64x64xf32>
    %22 = tpu.matmul %20, %0, %cst_10 {dimension_numbers = #tpu.dot_dimension_numbers<[1], [0], [0], [1], [0, 0, 1, 1], [], []>} : vector<64x128xf32>, vector<128x64xf32>, vector<64x64xf32> -> vector<64x64xf32>
    %23 = arith.addf %22, %6 : vector<64x64xf32>
    %cst_11 = arith.constant 0.000000e+00 : f32
    %24 = vector.broadcast %cst_11 : f32 to vector<64x64xf32>
    %25 = arith.maximumf %23, %24 : vector<64x64xf32>
    %cst_12 = arith.constant dense<0.000000e+00> : vector<64x64xf32>
    %26 = tpu.matmul %25, %1, %cst_12 {dimension_numbers = #tpu.dot_dimension_numbers<[1], [0], [0], [1], [0, 0, 1, 1], [], []>} : vector<64x64xf32>, vector<64x64xf32>, vector<64x64xf32> -> vector<64x64xf32>
    %27 = arith.addf %26, %9 : vector<64x64xf32>
    %cst_13 = arith.constant 0.000000e+00 : f32
    %28 = vector.broadcast %cst_13 : f32 to vector<64x64xf32>
    %29 = arith.maximumf %27, %28 : vector<64x64xf32>
    %cst_14 = arith.constant dense<0.000000e+00> : vector<64x128xf32>
    %30 = tpu.matmul %29, %2, %cst_14 {dimension_numbers = #tpu.dot_dimension_numbers<[1], [0], [0], [1], [0, 0, 1, 1], [], []>} : vector<64x64xf32>, vector<64x128xf32>, vector<64x128xf32> -> vector<64x128xf32>
    %31 = arith.addf %30, %12 : vector<64x128xf32>
    %32 = arith.addf %21, %31 : vector<64x128xf32>
    %33 = vector.broadcast %17 : vector<1x128xf32> to vector<64x128xf32>
    %34 = arith.mulf %31, %33 : vector<64x128xf32>
    %35 = arith.subf %20, %34 : vector<64x128xf32>
    %cst_15 = arith.constant dense<0.000000e+00> : vector<64x64xf32>
    %36 = tpu.matmul %35, %0, %cst_15 {dimension_numbers = #tpu.dot_dimension_numbers<[1], [0], [0], [1], [0, 0, 1, 1], [], []>} : vector<64x128xf32>, vector<128x64xf32>, vector<64x64xf32> -> vector<64x64xf32>
    %37 = arith.addf %36, %6 : vector<64x64xf32>
    %cst_16 = arith.constant 0.000000e+00 : f32
    %38 = vector.broadcast %cst_16 : f32 to vector<64x64xf32>
    %39 = arith.maximumf %37, %38 : vector<64x64xf32>
    %cst_17 = arith.constant dense<0.000000e+00> : vector<64x64xf32>
    %40 = tpu.matmul %39, %1, %cst_17 {dimension_numbers = #tpu.dot_dimension_numbers<[1], [0], [0], [1], [0, 0, 1, 1], [], []>} : vector<64x64xf32>, vector<64x64xf32>, vector<64x64xf32> -> vector<64x64xf32>
    %41 = arith.addf %40, %9 : vector<64x64xf32>
    %cst_18 = arith.constant 0.000000e+00 : f32
    %42 = vector.broadcast %cst_18 : f32 to vector<64x64xf32>
    %43 = arith.maximumf %41, %42 : vector<64x64xf32>
    %cst_19 = arith.constant dense<0.000000e+00> : vector<64x128xf32>
    %44 = tpu.matmul %43, %2, %cst_19 {dimension_numbers = #tpu.dot_dimension_numbers<[1], [0], [0], [1], [0, 0, 1, 1], [], []>} : vector<64x64xf32>, vector<64x128xf32>, vector<64x128xf32> -> vector<64x128xf32>
    %45 = arith.addf %44, %12 : vector<64x128xf32>
    %46 = arith.addf %32, %45 : vector<64x128xf32>
    %47 = vector.broadcast %17 : vector<1x128xf32> to vector<64x128xf32>
    %48 = arith.mulf %45, %47 : vector<64x128xf32>
    %49 = arith.subf %35, %48 : vector<64x128xf32>
    %cst_20 = arith.constant dense<0.000000e+00> : vector<64x64xf32>
    %50 = tpu.matmul %49, %0, %cst_20 {dimension_numbers = #tpu.dot_dimension_numbers<[1], [0], [0], [1], [0, 0, 1, 1], [], []>} : vector<64x128xf32>, vector<128x64xf32>, vector<64x64xf32> -> vector<64x64xf32>
    %51 = arith.addf %50, %6 : vector<64x64xf32>
    %cst_21 = arith.constant 0.000000e+00 : f32
    %52 = vector.broadcast %cst_21 : f32 to vector<64x64xf32>
    %53 = arith.maximumf %51, %52 : vector<64x64xf32>
    %cst_22 = arith.constant dense<0.000000e+00> : vector<64x64xf32>
    %54 = tpu.matmul %53, %1, %cst_22 {dimension_numbers = #tpu.dot_dimension_numbers<[1], [0], [0], [1], [0, 0, 1, 1], [], []>} : vector<64x64xf32>, vector<64x64xf32>, vector<64x64xf32> -> vector<64x64xf32>
    %55 = arith.addf %54, %9 : vector<64x64xf32>
    %cst_23 = arith.constant 0.000000e+00 : f32
    %56 = vector.broadcast %cst_23 : f32 to vector<64x64xf32>
    %57 = arith.maximumf %55, %56 : vector<64x64xf32>
    %cst_24 = arith.constant dense<0.000000e+00> : vector<64x128xf32>
    %58 = tpu.matmul %57, %2, %cst_24 {dimension_numbers = #tpu.dot_dimension_numbers<[1], [0], [0], [1], [0, 0, 1, 1], [], []>} : vector<64x64xf32>, vector<64x128xf32>, vector<64x128xf32> -> vector<64x128xf32>
    %59 = arith.addf %58, %12 : vector<64x128xf32>
    %60 = arith.addf %46, %59 : vector<64x128xf32>
    %61 = vector.shape_cast %15 : vector<1x128xi1> to vector<1x128xi1>
    %62 = vector.broadcast %61 : vector<1x128xi1> to vector<64x128xi1>
    %63 = arith.select %62, %59, %60 : vector<64x128xi1>, vector<64x128xf32>
    %c0_25 = arith.constant 0 : index
    %c0_26 = arith.constant 0 : index
    %64 = vector.load %arg6[%c0_25, %c0_26] : memref<64x128xf32, #tpu.memory_space<vmem>>, vector<64x128xf32>
    tpu.vector_store %arg6[%c0_25, %c0_26], %63 {strides = array<i32>} : memref<64x128xf32, #tpu.memory_space<vmem>>, vector<64x128xf32>,
    return
  }
  func.func @transform_0(%arg0: i32) -> (i32, i32) {
    %c0_i32 = arith.constant 0 : i32
    %c0_i32_0 = arith.constant 0 : i32
    return %arg0, %c0_i32 : i32, i32
  }
  func.func @transform_1(%arg0: i32) -> (i32, i32) {
    %c0_i32 = arith.constant 0 : i32
    %c0_i32_0 = arith.constant 0 : i32
    %c0_i32_1 = arith.constant 0 : i32
    return %c0_i32, %c0_i32_0 : i32, i32
  }
  func.func @transform_2(%arg0: i32) -> (i32, i32) {
    %c0_i32 = arith.constant 0 : i32
    %c0_i32_0 = arith.constant 0 : i32
    %c0_i32_1 = arith.constant 0 : i32
    return %c0_i32, %c0_i32_0 : i32, i32
  }
  func.func @transform_3(%arg0: i32) -> (i32, i32) {
    %c0_i32 = arith.constant 0 : i32
    %c0_i32_0 = arith.constant 0 : i32
    %c0_i32_1 = arith.constant 0 : i32
    return %c0_i32, %c0_i32_0 : i32, i32
  }
  func.func @transform_4(%arg0: i32) -> (i32, i32) {
    %c0_i32 = arith.constant 0 : i32
    %c0_i32_0 = arith.constant 0 : i32
    %c0_i32_1 = arith.constant 0 : i32
    return %c0_i32, %c0_i32_0 : i32, i32
  }
  func.func @transform_5(%arg0: i32) -> (i32, i32) {
    %c0_i32 = arith.constant 0 : i32
    %c0_i32_0 = arith.constant 0 : i32
    return %arg0, %c0_i32 : i32, i32
  }
}

</mosaic_0001>

<bundles_post_ra>
// kernel: nbeats_stack.1
= control target key start
LH: loop header
LB: loop body
LE: loop exit
PB: predicated region body
PF: predicated region fallthrough
CT: control target
= control target key end

     0   :  { %vm78_vm0 = vcmask 523264   ;;  %v53_v47 = vlaneseq  ;;  %s2646_s1 = inlined_call_operand.vmem [shape: f32[128,64], index: 1, kind: input, shape index: {}]   ;;  %s2647_s0 = inlined_call_operand.vmem [shape: f32[64,64], index: 0, kind: input, shape index: {}]   ;;  %s2648_s2 = inlined_call_operand.vmem [shape: f32[64,64], index: 2, kind: input, shape index: {}]   ;;  %s2649_s3 = inlined_call_operand.vmem [shape: f32[64,128], index: 3, kind: input, shape index: {}]   ;;  %s2650_s4 = inlined_call_operand.vmem [shape: f32[8,128], index: 4, kind: input, shape index: {}]   ;;  %s2651_s5 = inlined_call_operand.vmem [shape: f32[64,128], index: 5, kind: output, shape index: {}]  }
   0x1   :  { %v20_v0 = vld [vmem:[%s2646_s1] sm:$0xff]  ;;  %v21_v1 = vld [vmem:[%s2646_s1 + $0x8] sm:$0xff]  ;;  %v22_v2 = vld [vmem:[%s2646_s1 + $0x10] sm:$0xff] }
   0x2   :  { %v2059_v3 = vpack.c.bf16 %v21_v1, %v20_v0  ;;  %v23_v4 = vld [vmem:[%s2646_s1 + $0x18] sm:$0xff]  ;;  %v24_v6 = vld [vmem:[%s2646_s1 + $0x20] sm:$0xff]  ;;  %v25_v7 = vld [vmem:[%s2646_s1 + $0x28] sm:$0xff]  ;;  %v2253_v48 = vshrl.u32 %v53_v47, 7 }
   0x3   :  { %v2064_v5 = vpack.c.bf16 %v23_v4, %v22_v2  ;;  %v2075_v8 = vpack.c.bf16 %v25_v7, %v24_v6  ;;  %v2080_v9 = vld [vmem:[%s2647_s0] sm:$0xff]  ;;  %v26_v10 = vld [vmem:[%s2646_s1 + $0x30] sm:$0xff]  ;;  %v27_v11 = vld [vmem:[%s2646_s1 + $0x38] sm:$0xff] }
   0x4   :  { %1827 = vmatprep.subr.bf16.mxu0 %v2059_v3  ;;  %1558 = vmatprep.mubr.msk.f32.mxu0 %vm78_vm0, %v2080_v9  ;;  %v36_v12 = vld [vmem:[%s2648_s2] sm:$0xff]  ;;  %v37_v13 = vld [vmem:[%s2648_s2 + $0x8] sm:$0xff]  ;;  %v38_v14 = vld [vmem:[%s2648_s2 + $0x10] sm:$0xff]  ;;  %v2101_v15 = vpack.c.bf16 %v27_v11, %v26_v10  ;;  %v55_v49 = vsub.s32 0, %v2253_v48 }
   0x5   :  { %1829 = vmatpush3.bf16.msra.mxu0 %v2059_v3  ;;  %v28_v16 = vld [vmem:[%s2646_s1 + $0x40] sm:$0xff]  ;;  %v2106_v17 = vpack.c.bf16 %v37_v13, %v36_v12  ;;  %v39_v18 = vld [vmem:[%s2648_s2 + $0x18] sm:$0xff]  ;;  %v29_v19 = vld [vmem:[%s2646_s1 + $0x48] sm:$0xff] }
   0x6   :  { %1831 = vmatprep.subr.bf16.mxu0 %v2064_v5  ;;  %v2114_v20 = vpack.c.bf16 %v39_v18, %v38_v14  ;;  %v40_v21 = vld [vmem:[%s2648_s2 + $0x20] sm:$0xff]  ;;  %v41_v22 = vld [vmem:[%s2648_s2 + $0x28] sm:$0xff]  ;;  %v2126_v23 = vpack.c.bf16 %v29_v19, %v28_v16  ;;  %v30_v25 = vld [vmem:[%s2646_s1 + $0x50] sm:$0xff] }
   0x7   :  { %1859 = vmatprep.subr.bf16.mxu1 %v2106_v17  ;;  %v2129_v24 = vpack.c.bf16 %v41_v22, %v40_v21  ;;  %v31_v26 = vld [vmem:[%s2646_s1 + $0x58] sm:$0xff]  ;;  %v32_v28 = vld [vmem:[%s2646_s1 + $0x60] sm:$0xff]  ;;  %v33_v29 = vld [vmem:[%s2646_s1 + $0x68] sm:$0xff] }
   0x8   :  { %1861 = vmatpush3.bf16.msra.mxu1 %v2106_v17  ;;  %v2140_v27 = vpack.c.bf16 %v31_v26, %v30_v25  ;;  %v2152_v30 = vpack.c.bf16 %v33_v29, %v32_v28  ;;  %v34_v31 = vld [vmem:[%s2646_s1 + $0x70] sm:$0xff]  ;;  %v35_v32 = vld [vmem:[%s2646_s1 + $0x78] sm:$0xff]  ;;  %v2170_v34 = vld [vmem:[%s2647_s0 + $0x8] sm:$0xff] }
   0x9   :  { %1833 = vmatpush3.bf16.msra.mxu0 %v2064_v5  ;;  %1863 = vmatprep.subr.bf16.mxu1 %v2114_v20  ;;  %v2162_v33 = vpack.c.bf16 %v35_v32, %v34_v31  ;;  %v2175_v35 = vld [vmem:[%s2647_s0 + $0x10] sm:$0xff]  ;;  %v2185_v36 = vld [vmem:[%s2647_s0 + $0x18] sm:$0xff]  ;;  %v2191_v37 = vld [vmem:[%s2647_s0 + $0x20] sm:$0xff]  ;;  %v59_v32 = vsub.s32 1, %v2253_v48 }
   0xa   :  { %1835 = vmatprep.subr.bf16.mxu0 %v2075_v8  ;;  %v2201_v38 = vld [vmem:[%s2647_s0 + $0x28] sm:$0xff]  ;;  %v2207_v39 = vld [vmem:[%s2647_s0 + $0x30] sm:$0xff]  ;;  %v2217_v40 = vld [vmem:[%s2647_s0 + $0x38] sm:$0xff] }
   0xb   :  { %v42_v41 = vld [vmem:[%s2648_s2 + $0x30] sm:$0xff]  ;;  %v43_v42 = vld [vmem:[%s2648_s2 + $0x38] sm:$0xff]  ;;  %v44_v44 = vld [vmem:[%s2649_s3] sm:$0xff] }
   0xc   :  { %1865 = vmatpush3.bf16.msra.mxu1 %v2114_v20  ;;  %v2239_v43 = vpack.c.bf16 %v43_v42, %v42_v41  ;;  %v45_v45 = vld [vmem:[%s2649_s3 + $0x8] sm:$0xff]  ;;  %v2259_v50 = vld [vmem:[%s2650_s4] sm:$0xff]  ;;  %v46_v56 = vld [vmem:[%s2649_s3 + $0x10] sm:$0xff] }
   0xd   :  { %1837 = vmatpush3.bf16.msra.mxu0 %v2075_v8  ;;  %1867 = vmatprep.subr.bf16.mxu1 %v2129_v24  ;;  %v2249_v46 = vpack.c.bf16 %v45_v45, %v44_v44  ;;  %v2262_v51 = vrot.slane %v2259_v50, %v55_v49  ;;  %v47_v57 = vld [vmem:[%s2649_s3 + $0x18] sm:$0xff]  ;;  %v48_v1 = vld [vmem:[%s2649_s3 + $0x20] sm:$0xff]  ;;  %v49_v2 = vld [vmem:[%s2649_s3 + $0x28] sm:$0xff]  ;;  %v2314_v41 = vrot.slane %v2259_v50, %v59_v32 }
   0xe   :  { %1839 = vmatprep.subr.bf16.mxu0 %v2101_v15  ;;  %v2273_v63 = vpack.c.bf16 %v47_v57, %v46_v56  ;;  %v2287_v12 = vpack.c.bf16 %v49_v2, %v48_v1  ;;  %v50_v28 = vld [vmem:[%s2649_s3 + $0x30] sm:$0xff]  ;;  %v51_v29 = vld [vmem:[%s2649_s3 + $0x38] sm:$0xff] }
   0xf   :  { %v2307_v31 = vpack.c.bf16 %v51_v29, %v50_v28  ;;  %v80_v28 = vsel %vm78_vm0, %v2170_v34, 0.0 }
  0x10   :  { %1869 = vmatpush3.bf16.msra.mxu1 %v2129_v24 }
  0x11   :  { %1841 = vmatpush3.bf16.msra.mxu0 %v2101_v15  ;;  %1871 = vmatprep.subr.bf16.mxu1 %v2239_v43 }
  0x12   :  { %1843 = vmatprep.subr.bf16.mxu0 %v2126_v23 }
  0x14   :  { %1873 = vmatpush3.bf16.msra.mxu1 %v2239_v43 }
  0x15   :  { %1845 = vmatpush3.bf16.msra.mxu0 %v2126_v23  ;;  %1875 = vmatprep.subr.bf16.mxu1 %v2249_v46 }
  0x16   :  { %1847 = vmatprep.subr.bf16.mxu0 %v2140_v27 }
  0x19   :  { %1849 = vmatpush3.bf16.msra.mxu0 %v2140_v27 }
  0x1a   :  { %1851 = vmatprep.subr.bf16.mxu0 %v2152_v30 }
  0x1d   :  { %1853 = vmatpush3.bf16.msra.mxu0 %v2152_v30 }
  0x1e   :  { %1855 = vmatprep.subr.bf16.mxu0 %v2162_v33 }
  0x21   :  { %1857 = vmatpush3.bf16.msra.mxu0 %v2162_v33 }
  0x22   :  { %1891 = vmatprep.subr.bf16.mxu0 %v2059_v3 }
  0x24   :  { %1559 = vmatmul.mubr.msk.f32.vlgmr.msra.gmra.mrb[0].mxu0 %vm78_vm0, %v2170_v34 }
  0x25   :  { %1561 = vmatprep.mubr.msk.f32.mxu0 %vm78_vm0, %v2175_v35  ;;  %1893 = vmatpush3.bf16.msra.mxu0 %v2059_v3 }
  0x26   :  { %1895 = vmatprep.subr.bf16.mxu0 %v2064_v5 }
  0x28   :  { %1562 = vmatmul.mubr.msk.f32.gmra.mrb[2].mxu0 %vm78_vm0, %v2185_v36 }
  0x29   :  { %1564 = vmatprep.mubr.msk.f32.mxu0 %vm78_vm0, %v2191_v37  ;;  %1897 = vmatpush3.bf16.msra.mxu0 %v2064_v5 }
  0x2a   :  { %1899 = vmatprep.subr.bf16.mxu0 %v2075_v8 }
  0x2c   :  { %1565 = vmatmul.mubr.msk.f32.gmra.mrb[4].mxu0 %vm78_vm0, %v2201_v38 }
  0x2d   :  { %1567 = vmatprep.mubr.msk.f32.mxu0 %vm78_vm0, %v2207_v39  ;;  %1901 = vmatpush3.bf16.msra.mxu0 %v2075_v8 }
  0x2e   :  { %1903 = vmatprep.subr.bf16.mxu0 %v2101_v15 }
  0x30   :  { %1568 = vmatmul.mubr.msk.f32.gmra.mrb[6].mxu0 %vm78_vm0, %v2217_v40 }
  0x31   :  { %1905 = vmatpush3.bf16.msra.mxu0 %v2101_v15 }
  0x32   :  { %1907 = vmatprep.subr.bf16.mxu0 %v2126_v23 }
  0x35   :  { %1909 = vmatpush3.bf16.msra.mxu0 %v2126_v23 }
  0x36   :  { %1911 = vmatprep.subr.bf16.mxu0 %v2140_v27 }
  0x39   :  { %1913 = vmatpush3.bf16.msra.mxu0 %v2140_v27 }
  0x3a   :  { %1915 = vmatprep.subr.bf16.mxu0 %v2152_v30 }
  0x3d   :  { %1917 = vmatpush3.bf16.msra.mxu0 %v2152_v30 }
  0x3e   :  { %1919 = vmatprep.subr.bf16.mxu0 %v2162_v33 }
  0x41   :  { %1921 = vmatpush3.bf16.msra.mxu0 %v2162_v33 }
  0x42   :  { %1955 = vmatprep.subr.bf16.mxu0 %v2059_v3 }
  0xf7   :  { %v1560_v52 = vpop.f32.mrb[0].mxu0 }
  0xf8   :  { %v159_v53 = vadd.f32 %v1560_v52, %v2262_v51  ;;  %v153_v54 = vpop.f32.mrb[1].mxu0 }
  0xf9   :  { %v154_v55 = vadd.f32 %v153_v54, %v2262_v51 }
  0xfa   :  { %v193_v60 = vmax.f32 %v159_v53, 0.0 }
  0xfb   :  { %v192_v58 = vmax.f32 %v154_v55, 0.0  ;;  %v1563_v59 = vpop.f32.mrb[2].mxu0 }
  0xfc   :  { %v169_v61 = vadd.f32 %v1563_v59, %v2262_v51  ;;  %v163_v62 = vpop.f32.mrb[3].mxu0 }
  0xfd   :  { %v164_v0 = vadd.f32 %v163_v62, %v2262_v51  ;;  %1586 = vmatprep.mubr.msk.f32.mxu1 %vm78_vm0, %v192_v58 }
  0xfe   :  { %1587 = vmatmul.mubr.msk.f32.vlgmr.msra.gmra.mrb[0].mxu1 %vm78_vm0, %v193_v60  ;;  %v195_v7 = vmax.f32 %v169_v61, 0.0 }
  0xff   :  { %v194_v4 = vmax.f32 %v164_v0, 0.0  ;;  %v1566_v6 = vpop.f32.mrb[4].mxu0  ;;  %1877 = vmatpush3.bf16.msra.mxu1 %v2249_v46 }
 0x100   :  { %v179_v10 = vadd.f32 %v1566_v6, %v2262_v51  ;;  %v173_v11 = vpop.f32.mrb[5].mxu0  ;;  %1879 = vmatprep.subr.bf16.mxu1 %v2273_v63 }
 0x101   :  { %v174_v13 = vadd.f32 %v173_v11, %v2262_v51  ;;  %1589 = vmatprep.mubr.msk.f32.mxu1 %vm78_vm0, %v194_v4 }
 0x102   :  { %1590 = vmatmul.mubr.msk.f32.gmra.mrb[2].mxu1 %vm78_vm0, %v195_v7  ;;  %v197_v18 = vmax.f32 %v179_v10, 0.0 }
 0x103   :  { %v196_v14 = vmax.f32 %v174_v13, 0.0  ;;  %v1569_v16 = vpop.f32.mrb[6].mxu0  ;;  %1881 = vmatpush3.bf16.msra.mxu1 %v2273_v63 }
 0x104   :  { %v189_v19 = vadd.f32 %v1569_v16, %v2262_v51  ;;  %v183_v21 = vpop.f32.mrb[7].mxu0  ;;  %1883 = vmatprep.subr.bf16.mxu1 %v2287_v12  ;;  %v2342_v16 = vand.u32 127, %v53_v47  ;;  %v79_v47 = vsel %vm78_vm0, %v2080_v9, 0.0  ;;  %v81_v9 = vsel %vm78_vm0, %v2175_v35, 0.0 }
 0x105   :  { %v184_v22 = vadd.f32 %v183_v21, %v2262_v51  ;;  %1592 = vmatprep.mubr.msk.f32.mxu1 %vm78_vm0, %v196_v14  ;;  %v63_v14 = vsub.s32 2, %v2253_v48 }
 0x106   :  { %1593 = vmatmul.mubr.msk.f32.gmra.mrb[4].mxu1 %vm78_vm0, %v197_v18  ;;  %v199_v26 = vmax.f32 %v189_v19, 0.0  ;;  %vm67_vm1 = vcmp.lt.s32.totalorder %v2342_v16, 64  ;;  %v2019_v19 = vmov 0.0  }
 0x107   :  { %v198_v25 = vmax.f32 %v184_v22, 0.0  ;;  %1885 = vmatpush3.bf16.msra.mxu1 %v2287_v12  ;;  %v2345_v18 = vrot.slane %v2259_v50, %v63_v14  ;;  %v2350_v21 = vsel %vm67_vm1, 1.0, %v2019_v19 }
 0x108   :  { %1887 = vmatprep.subr.bf16.mxu1 %v2307_v31 }
 0x109   :  { %1595 = vmatprep.mubr.msk.f32.mxu1 %vm78_vm0, %v198_v25 }
 0x10a   :  { %1596 = vmatmul.mubr.msk.f32.gmra.mrb[6].mxu1 %vm78_vm0, %v199_v26 }
 0x10b   :  { %1889 = vmatpush3.bf16.msra.mxu1 %v2307_v31 }
 0x10c   :  { %1923 = vmatprep.subr.bf16.mxu1 %v2106_v17 }
 0x1d1   :  { %v1588_v42 = vpop.f32.mrb[0].mxu1 }
 0x1d2   :  { %v296_v44 = vadd.f32 %v1588_v42, %v2314_v41  ;;  %v290_v45 = vpop.f32.mrb[1].mxu1 }
 0x1d3   :  { %v291_v49 = vadd.f32 %v290_v45, %v2314_v41 }
 0x1d4   :  { %v330_v54 = vmax.f32 %v296_v44, 0.0 }
 0x1d5   :  { %v329_v52 = vmax.f32 %v291_v49, 0.0  ;;  %v1591_v53 = vpop.f32.mrb[2].mxu1 }
 0x1d6   :  { %v306_v55 = vadd.f32 %v1591_v53, %v2314_v41  ;;  %v300_v56 = vpop.f32.mrb[3].mxu1  ;;  %v82_v53 = vsel %vm78_vm0, %v2185_v36, 0.0  ;;  %v83_v36 = vsel %vm78_vm0, %v2191_v37, 0.0 }
 0x1d7   :  { %v301_v57 = vadd.f32 %v300_v56, %v2314_v41  ;;  %1614 = vmatprep.mubr.msk.f32.mxu1 %vm78_vm0, %v329_v52 }
 0x1d8   :  { %1615 = vmatmul.mubr.msk.f32.vlgmr.msra.gmra.mrb[8].mxu1 %vm78_vm0, %v330_v54  ;;  %v332_v60 = vmax.f32 %v306_v55, 0.0 }
 0x1d9   :  { %v331_v58 = vmax.f32 %v301_v57, 0.0  ;;  %v1594_v59 = vpop.f32.mrb[4].mxu1  ;;  %1925 = vmatpush3.bf16.msra.mxu1 %v2106_v17 }
 0x1da   :  { %v316_v61 = vadd.f32 %v1594_v59, %v2314_v41  ;;  %v310_v62 = vpop.f32.mrb[5].mxu1  ;;  %1927 = vmatprep.subr.bf16.mxu1 %v2114_v20 }
 0x1db   :  { %v311_v0 = vadd.f32 %v310_v62, %v2314_v41  ;;  %1617 = vmatprep.mubr.msk.f32.mxu1 %vm78_vm0, %v331_v58 }
 0x1dc   :  { %1618 = vmatmul.mubr.msk.f32.gmra.mrb[10].mxu1 %vm78_vm0, %v332_v60  ;;  %v334_v4 = vmax.f32 %v316_v61, 0.0  ;;  %v84_v61 = vsel %vm78_vm0, %v2201_v38, 0.0  ;;  %v85_v38 = vsel %vm78_vm0, %v2207_v39, 0.0 }
 0x1dd   :  { %v333_v1 = vmax.f32 %v311_v0, 0.0  ;;  %v1597_v2 = vpop.f32.mrb[6].mxu1  ;;  %1929 = vmatpush3.bf16.msra.mxu1 %v2114_v20 }
 0x1de   :  { %v326_v6 = vadd.f32 %v1597_v2, %v2314_v41  ;;  %v320_v7 = vpop.f32.mrb[7].mxu1  ;;  %1931 = vmatprep.subr.bf16.mxu1 %v2129_v24 }
 0x1df   :  { %v321_v10 = vadd.f32 %v320_v7, %v2314_v41  ;;  %1620 = vmatprep.mubr.msk.f32.mxu1 %vm78_vm0, %v333_v1  ;;  %v86_v7 = vsel %vm78_vm0, %v2217_v40, 0.0 }
 0x1e0   :  { %1621 = vmatmul.mubr.msk.f32.gmra.mrb[12].mxu1 %vm78_vm0, %v334_v4  ;;  %v336_v13 = vmax.f32 %v326_v6, 0.0 }
 0x1e1   :  { %v335_v11 = vmax.f32 %v321_v10, 0.0  ;;  %1933 = vmatpush3.bf16.msra.mxu1 %v2129_v24 }
 0x1e2   :  { %1935 = vmatprep.subr.bf16.mxu1 %v2239_v43 }
 0x1e3   :  { %1623 = vmatprep.mubr.msk.f32.mxu1 %vm78_vm0, %v335_v11 }
 0x1e4   :  { %1624 = vmatmul.mubr.msk.f32.gmra.mrb[14].mxu1 %vm78_vm0, %v336_v13 }
 0x1e5   :  { %1937 = vmatpush3.bf16.msra.mxu1 %v2239_v43 }
 0x1e6   :  { %1939 = vmatprep.subr.bf16.mxu1 %v2249_v46 }
 0x2ab   :  { %v1616_v22 = vpop.f32.mrb[8].mxu1 }
 0x2ac   :  { %v2353_v25 = vadd.f32 %v1616_v22, %v2345_v18  ;;  %v427_v26 = vpop.f32.mrb[9].mxu1 }
 0x2ad   :  { %v2356_v48 = vadd.f32 %v427_v26, %v2345_v18 }
 0x2ae   :  { %v475_v50 = vmul.f32 %v2350_v21, %v2353_v25 }
 0x2af   :  { %v474_v29 = vmul.f32 %v2350_v21, %v2356_v48  ;;  %v1619_v32 = vpop.f32.mrb[10].mxu1 }
 0x2b0   :  { %v2367_v42 = vadd.f32 %v1619_v32, %v2345_v18  ;;  %v437_v44 = vpop.f32.mrb[11].mxu1  ;;  %v2376_v52 = vsub.f32 %v80_v28, %v475_v50 }
 0x2b1   :  { %v2370_v45 = vadd.f32 %v437_v44, %v2345_v18  ;;  %v2372_v49 = vsub.f32 %v79_v47, %v474_v29 }
 0x2b2   :  { %v477_v34 = vmul.f32 %v2350_v21, %v2367_v42 }
 0x2b3   :  { %v476_v54 = vmul.f32 %v2350_v21, %v2370_v45  ;;  %v1622_v55 = vpop.f32.mrb[12].mxu1  ;;  %1658 = vmatprep.mubr.f32.mxu0 %v2372_v49 }
 0x2b4   :  { %v2386_v56 = vadd.f32 %v1622_v55, %v2345_v18  ;;  %v447_v57 = vpop.f32.mrb[13].mxu1  ;;  %1659 = vmatmul.mubr.f32.vlgmr.msra.gmra.mrb[8].mxu0 %v2376_v52  ;;  %v2399_v60 = vsub.f32 %v82_v53, %v477_v34 }
 0x2b5   :  { %v2390_v35 = vadd.f32 %v447_v57, %v2345_v18  ;;  %v2392_v58 = vsub.f32 %v81_v9, %v476_v54  ;;  %1957 = vmatpush3.bf16.msra.mxu0 %v2059_v3 }
 0x2b6   :  { %v479_v59 = vmul.f32 %v2350_v21, %v2386_v56  ;;  %1959 = vmatprep.subr.bf16.mxu0 %v2064_v5 }
 0x2b7   :  { %v478_v62 = vmul.f32 %v2350_v21, %v2390_v35  ;;  %v1625_v0 = vpop.f32.mrb[14].mxu1  ;;  %1661 = vmatprep.mubr.f32.mxu0 %v2392_v58 }
 0x2b8   :  { %v2408_v3 = vadd.f32 %v1625_v0, %v2345_v18  ;;  %v457_v37 = vpop.f32.mrb[15].mxu1  ;;  %1662 = vmatmul.mubr.f32.gmra.mrb[10].mxu0 %v2399_v60  ;;  %v2421_v6 = vsub.f32 %v84_v61, %v479_v59 }
 0x2b9   :  { %v2412_v1 = vadd.f32 %v457_v37, %v2345_v18  ;;  %v2414_v2 = vsub.f32 %v83_v36, %v478_v62  ;;  %1961 = vmatpush3.bf16.msra.mxu0 %v2064_v5 }
 0x2ba   :  { %v481_v4 = vmul.f32 %v2350_v21, %v2408_v3  ;;  %1963 = vmatprep.subr.bf16.mxu0 %v2075_v8 }
 0x2bb   :  { %v480_v10 = vmul.f32 %v2350_v21, %v2412_v1  ;;  %1664 = vmatprep.mubr.f32.mxu0 %v2414_v2 }
 0x2bc   :  { %1665 = vmatmul.mubr.f32.gmra.mrb[12].mxu0 %v2421_v6  ;;  %v2433_v39 = vsub.f32 %v86_v7, %v481_v4 }
 0x2bd   :  { %v2430_v5 = vsub.f32 %v85_v38, %v480_v10  ;;  %1965 = vmatpush3.bf16.msra.mxu0 %v2075_v8 }
 0x2be   :  { %1967 = vmatprep.subr.bf16.mxu0 %v2101_v15 }
 0x2bf   :  { %1667 = vmatprep.mubr.f32.mxu0 %v2430_v5 }
 0x2c0   :  { %1668 = vmatmul.mubr.f32.gmra.mrb[14].mxu0 %v2433_v39 }
 0x2c1   :  { %1969 = vmatpush3.bf16.msra.mxu0 %v2101_v15 }
 0x2c2   :  { %1971 = vmatprep.subr.bf16.mxu0 %v2126_v23 }
 0x2c5   :  { %1973 = vmatpush3.bf16.msra.mxu0 %v2126_v23 }
 0x2c6   :  { %1975 = vmatprep.subr.bf16.mxu0 %v2140_v27 }
 0x2c9   :  { %1977 = vmatpush3.bf16.msra.mxu0 %v2140_v27 }
 0x2ca   :  { %1979 = vmatprep.subr.bf16.mxu0 %v2152_v30 }
 0x2cd   :  { %1981 = vmatpush3.bf16.msra.mxu0 %v2152_v30 }
 0x2ce   :  { %1983 = vmatprep.subr.bf16.mxu0 %v2162_v33 }
 0x2d1   :  { %1985 = vmatpush3.bf16.msra.mxu0 %v2162_v33 }
 0x387   :  { %v1660_v8 = vpop.f32.mrb[8].mxu0 }
 0x388   :  { %v562_v40 = vadd.f32 %v1660_v8, %v2262_v51  ;;  %v556_v15 = vpop.f32.mrb[9].mxu0 }
 0x389   :  { %v557_v11 = vadd.f32 %v556_v15, %v2262_v51 }
 0x38a   :  { %v596_v14 = vmax.f32 %v562_v40, 0.0 }
 0x38b   :  { %v595_v13 = vmax.f32 %v557_v11, 0.0  ;;  %v1663_v23 = vpop.f32.mrb[10].mxu0 }
 0x38c   :  { %v572_v19 = vadd.f32 %v1663_v23, %v2262_v51  ;;  %v566_v27 = vpop.f32.mrb[11].mxu0 }
 0x38d   :  { %v567_v22 = vadd.f32 %v566_v27, %v2262_v51  ;;  %1686 = vmatprep.mubr.msk.f32.mxu1 %vm78_vm0, %v595_v13 }
 0x38e   :  { %1687 = vmatmul.mubr.msk.f32.vlgmr.msra.gmra.mrb[16].mxu1 %vm78_vm0, %v596_v14  ;;  %v598_v26 = vmax.f32 %v572_v19, 0.0 }
 0x38f   :  { %v597_v30 = vmax.f32 %v567_v22, 0.0  ;;  %v1666_v33 = vpop.f32.mrb[12].mxu0  ;;  %1941 = vmatpush3.bf16.msra.mxu1 %v2249_v46 }
 0x390   :  { %v582_v47 = vadd.f32 %v1666_v33, %v2262_v51  ;;  %v576_v50 = vpop.f32.mrb[13].mxu0  ;;  %1943 = vmatprep.subr.bf16.mxu1 %v2273_v63 }
 0x391   :  { %v577_v28 = vadd.f32 %v576_v50, %v2262_v51  ;;  %1689 = vmatprep.mubr.msk.f32.mxu1 %vm78_vm0, %v597_v30 }
 0x392   :  { %1690 = vmatmul.mubr.msk.f32.gmra.mrb[18].mxu1 %vm78_vm0, %v598_v26  ;;  %v600_v44 = vmax.f32 %v582_v47, 0.0 }
 0x393   :  { %v599_v29 = vmax.f32 %v577_v28, 0.0  ;;  %v1669_v32 = vpop.f32.mrb[14].mxu0  ;;  %1945 = vmatpush3.bf16.msra.mxu1 %v2273_v63 }
 0x394   :  { %v592_v9 = vadd.f32 %v1669_v32, %v2262_v51  ;;  %v586_v34 = vpop.f32.mrb[15].mxu0  ;;  %1947 = vmatprep.subr.bf16.mxu1 %v2287_v12 }
 0x395   :  { %v587_v53 = vadd.f32 %v586_v34, %v2262_v51  ;;  %1692 = vmatprep.mubr.msk.f32.mxu1 %vm78_vm0, %v599_v29 }
 0x396   :  { %1693 = vmatmul.mubr.msk.f32.gmra.mrb[20].mxu1 %vm78_vm0, %v600_v44  ;;  %v602_v55 = vmax.f32 %v592_v9, 0.0 }
 0x397   :  { %v601_v54 = vmax.f32 %v587_v53, 0.0  ;;  %1949 = vmatpush3.bf16.msra.mxu1 %v2287_v12 }
 0x398   :  { %1951 = vmatprep.subr.bf16.mxu1 %v2307_v31 }
 0x399   :  { %1695 = vmatprep.mubr.msk.f32.mxu1 %vm78_vm0, %v601_v54 }
 0x39a   :  { %1696 = vmatmul.mubr.msk.f32.gmra.mrb[22].mxu1 %vm78_vm0, %v602_v55 }
 0x39b   :  { %1953 = vmatpush3.bf16.msra.mxu1 %v2307_v31 }
 0x39c   :  { %1987 = vmatprep.subr.bf16.mxu1 %v2106_v17 }
 0x461   :  { %v1688_v57 = vpop.f32.mrb[16].mxu1 }
 0x462   :  { %v699_v36 = vadd.f32 %v1688_v57, %v2314_v41  ;;  %v693_v59 = vpop.f32.mrb[17].mxu1 }
 0x463   :  { %v694_v61 = vadd.f32 %v693_v59, %v2314_v41 }
 0x464   :  { %v733_v37 = vmax.f32 %v699_v36, 0.0 }
 0x465   :  { %v732_v62 = vmax.f32 %v694_v61, 0.0  ;;  %v1691_v0 = vpop.f32.mrb[18].mxu1 }
 0x466   :  { %v709_v38 = vadd.f32 %v1691_v0, %v2314_v41  ;;  %v703_v4 = vpop.f32.mrb[19].mxu1 }
 0x467   :  { %v704_v7 = vadd.f32 %v703_v4, %v2314_v41  ;;  %1714 = vmatprep.mubr.msk.f32.mxu1 %vm78_vm0, %v732_v62 }
 0x468   :  { %1715 = vmatmul.mubr.msk.f32.vlgmr.msra.gmra.mrb[24].mxu1 %vm78_vm0, %v733_v37  ;;  %v735_v40 = vmax.f32 %v709_v38, 0.0 }
 0x469   :  { %v734_v10 = vmax.f32 %v704_v7, 0.0  ;;  %v1694_v8 = vpop.f32.mrb[20].mxu1  ;;  %1989 = vmatpush3.bf16.msra.mxu1 %v2106_v17 }
 0x46a   :  { %v719_v15 = vadd.f32 %v1694_v8, %v2314_v41  ;;  %v713_v11 = vpop.f32.mrb[21].mxu1  ;;  %1991 = vmatprep.subr.bf16.mxu1 %v2114_v20 }
 0x46b   :  { %v714_v13 = vadd.f32 %v713_v11, %v2314_v41  ;;  %1717 = vmatprep.mubr.msk.f32.mxu1 %vm78_vm0, %v734_v10 }
 0x46c   :  { %1718 = vmatmul.mubr.msk.f32.gmra.mrb[26].mxu1 %vm78_vm0, %v735_v40  ;;  %v737_v19 = vmax.f32 %v719_v15, 0.0 }
 0x46d   :  { %v736_v23 = vmax.f32 %v714_v13, 0.0  ;;  %v1697_v14 = vpop.f32.mrb[22].mxu1  ;;  %1993 = vmatpush3.bf16.msra.mxu1 %v2114_v20 }
 0x46e   :  { %v729_v27 = vadd.f32 %v1697_v14, %v2314_v41  ;;  %v723_v17 = vpop.f32.mrb[23].mxu1  ;;  %1995 = vmatprep.subr.bf16.mxu1 %v2129_v24 }
 0x46f   :  { %v724_v22 = vadd.f32 %v723_v17, %v2314_v41  ;;  %1720 = vmatprep.mubr.msk.f32.mxu1 %vm78_vm0, %v736_v23 }
 0x470   :  { %1721 = vmatmul.mubr.msk.f32.gmra.mrb[28].mxu1 %vm78_vm0, %v737_v19  ;;  %v739_v33 = vmax.f32 %v729_v27, 0.0 }
 0x471   :  { %v738_v30 = vmax.f32 %v724_v22, 0.0  ;;  %1997 = vmatpush3.bf16.msra.mxu1 %v2129_v24 }
 0x472   :  { %1999 = vmatprep.subr.bf16.mxu1 %v2239_v43 }
 0x473   :  { %1723 = vmatprep.mubr.msk.f32.mxu1 %vm78_vm0, %v738_v30 }
 0x474   :  { %1724 = vmatmul.mubr.msk.f32.gmra.mrb[30].mxu1 %vm78_vm0, %v739_v33 }
 0x475   :  { %2001 = vmatpush3.bf16.msra.mxu1 %v2239_v43 }
 0x476   :  { %2003 = vmatprep.subr.bf16.mxu1 %v2249_v46 }
 0x53b   :  { %v1716_v20 = vpop.f32.mrb[24].mxu1 }
 0x53c   :  { %v2496_v26 = vadd.f32 %v1716_v20, %v2345_v18  ;;  %v830_v47 = vpop.f32.mrb[25].mxu1 }
 0x53d   :  { %v2499_v50 = vadd.f32 %v830_v47, %v2345_v18 }
 0x53e   :  { %v878_v24 = vmul.f32 %v2350_v21, %v2496_v26 }
 0x53f   :  { %v877_v28 = vmul.f32 %v2350_v21, %v2499_v50  ;;  %v1719_v29 = vpop.f32.mrb[26].mxu1 }
 0x540   :  { %v2506_v32 = vadd.f32 %v1719_v29, %v2345_v18  ;;  %v840_v43 = vpop.f32.mrb[27].mxu1  ;;  %v886_v34 = vsub.f32 %v2376_v52, %v878_v24 }
 0x541   :  { %v2509_v44 = vadd.f32 %v840_v43, %v2345_v18  ;;  %v885_v9 = vsub.f32 %v2372_v49, %v877_v28 }
 0x542   :  { %v880_v53 = vmul.f32 %v2350_v21, %v2506_v32 }
 0x543   :  { %v879_v54 = vmul.f32 %v2350_v21, %v2509_v44  ;;  %v1722_v55 = vpop.f32.mrb[28].mxu1  ;;  %1758 = vmatprep.mubr.f32.mxu0 %v885_v9 }
 0x544   :  { %v2518_v57 = vadd.f32 %v1722_v55, %v2345_v18  ;;  %v850_v36 = vpop.f32.mrb[29].mxu1  ;;  %1759 = vmatmul.mubr.f32.vlgmr.msra.gmra.mrb[16].mxu0 %v886_v34  ;;  %v888_v61 = vsub.f32 %v2399_v60, %v880_v53 }
 0x545   :  { %v2521_v59 = vadd.f32 %v850_v36, %v2345_v18  ;;  %v887_v49 = vsub.f32 %v2392_v58, %v879_v54 }
 0x546   :  { %v882_v52 = vmul.f32 %v2350_v21, %v2518_v57 }
 0x547   :  { %v881_v62 = vmul.f32 %v2350_v21, %v2521_v59  ;;  %v1725_v0 = vpop.f32.mrb[30].mxu1  ;;  %1761 = vmatprep.mubr.f32.mxu0 %v887_v49 }
 0x548   :  { %v2530_v37 = vadd.f32 %v1725_v0, %v2345_v18  ;;  %v860_v38 = vpop.f32.mrb[31].mxu1  ;;  %1762 = vmatmul.mubr.f32.gmra.mrb[18].mxu0 %v888_v61  ;;  %v890_v60 = vsub.f32 %v2421_v6, %v882_v52 }
 0x549   :  { %v2533_v4 = vadd.f32 %v860_v38, %v2345_v18  ;;  %v889_v58 = vsub.f32 %v2414_v2, %v881_v62 }
 0x54a   :  { %v884_v7 = vmul.f32 %v2350_v21, %v2530_v37 }
 0x54b   :  { %v883_v10 = vmul.f32 %v2350_v21, %v2533_v4  ;;  %1764 = vmatprep.mubr.f32.mxu0 %v889_v58 }
 0x54c   :  { %1765 = vmatmul.mubr.f32.gmra.mrb[20].mxu0 %v890_v60  ;;  %v892_v40 = vsub.f32 %v2433_v39, %v884_v7 }
 0x54d   :  { %v891_v8 = vsub.f32 %v2430_v5, %v883_v10 }
 0x54f   :  { %1767 = vmatprep.mubr.f32.mxu0 %v891_v8 }
 0x550   :  { %1768 = vmatmul.mubr.f32.gmra.mrb[22].mxu0 %v892_v40 }
 0x617   :  { %v1760_v15 = vpop.f32.mrb[16].mxu0 }
 0x618   :  { %v965_v11 = vadd.f32 %v1760_v15, %v2262_v51  ;;  %v959_v2 = vpop.f32.mrb[17].mxu0 }
 0x619   :  { %v960_v13 = vadd.f32 %v959_v2, %v2262_v51 }
 0x61a   :  { %v999_v6 = vmax.f32 %v965_v11, 0.0 }
 0x61b   :  { %v998_v23 = vmax.f32 %v960_v13, 0.0  ;;  %v1763_v14 = vpop.f32.mrb[18].mxu0 }
 0x61c   :  { %v975_v19 = vadd.f32 %v1763_v14, %v2262_v51  ;;  %v969_v21 = vpop.f32.mrb[19].mxu0 }
 0x61d   :  { %v970_v27 = vadd.f32 %v969_v21, %v2262_v51  ;;  %1786 = vmatprep.mubr.msk.f32.mxu1 %vm78_vm0, %v998_v23  ;;  %v870_v23 = vadd.f32 %v2496_v26, %v2353_v25  ;;  %v871_v26 = vadd.f32 %v2509_v44, %v2370_v45 }
 0x61e   :  { %1787 = vmatmul.mubr.msk.f32.vlgmr.msra.gmra.mrb[32].mxu1 %vm78_vm0, %v999_v6  ;;  %v1001_v17 = vmax.f32 %v975_v19, 0.0 }
 0x61f   :  { %v1000_v5 = vmax.f32 %v970_v27, 0.0  ;;  %v1766_v39 = vpop.f32.mrb[20].mxu0  ;;  %2005 = vmatpush3.bf16.msra.mxu1 %v2249_v46 }
 0x620   :  { %v985_v22 = vadd.f32 %v1766_v39, %v2262_v51  ;;  %v979_v30 = vpop.f32.mrb[21].mxu0  ;;  %2007 = vmatprep.subr.bf16.mxu1 %v2273_v63  ;;  %v872_v39 = vadd.f32 %v2506_v32, %v2367_v42 }
 0x621   :  { %v980_v33 = vadd.f32 %v979_v30, %v2262_v51  ;;  %1789 = vmatprep.mubr.msk.f32.mxu1 %vm78_vm0, %v1000_v5 }
 0x622   :  { %1790 = vmatmul.mubr.msk.f32.gmra.mrb[34].mxu1 %vm78_vm0, %v1001_v17  ;;  %v1003_v24 = vmax.f32 %v985_v22, 0.0 }
 0x623   :  { %v1002_v20 = vmax.f32 %v980_v33, 0.0  ;;  %v1769_v47 = vpop.f32.mrb[22].mxu0  ;;  %2009 = vmatpush3.bf16.msra.mxu1 %v2273_v63  ;;  %v874_v33 = vadd.f32 %v2518_v57, %v2386_v56 }
 0x624   :  { %v995_v28 = vadd.f32 %v1769_v47, %v2262_v51  ;;  %v989_v46 = vpop.f32.mrb[23].mxu0  ;;  %2011 = vmatprep.subr.bf16.mxu1 %v2287_v12  ;;  %v873_v47 = vadd.f32 %v2521_v59, %v2390_v35 }
 0x625   :  { %v990_v29 = vadd.f32 %v989_v46, %v2262_v51  ;;  %1792 = vmatprep.mubr.msk.f32.mxu1 %vm78_vm0, %v1002_v20 }
 0x626   :  { %1793 = vmatmul.mubr.msk.f32.gmra.mrb[36].mxu1 %vm78_vm0, %v1003_v24  ;;  %v1005_v9 = vmax.f32 %v995_v28, 0.0 }
 0x627   :  { %v1004_v43 = vmax.f32 %v990_v29, 0.0  ;;  %2013 = vmatpush3.bf16.msra.mxu1 %v2287_v12  ;;  %v876_v29 = vadd.f32 %v2530_v37, %v2408_v3 }
 0x628   :  { %2015 = vmatprep.subr.bf16.mxu1 %v2307_v31 }
 0x629   :  { %1795 = vmatprep.mubr.msk.f32.mxu1 %vm78_vm0, %v1004_v43 }
 0x62a   :  { %1796 = vmatmul.mubr.msk.f32.gmra.mrb[38].mxu1 %vm78_vm0, %v1005_v9  ;;  %v875_v9 = vadd.f32 %v2533_v4, %v2412_v1 }
 0x62b   :  { %2017 = vmatpush3.bf16.msra.mxu1 %v2307_v31 }
 0x6f1   :  { %v1788_v63 = vpop.f32.mrb[32].mxu1 }
 0x6f2   :  { %v1102_v34 = vadd.f32 %v1788_v63, %v2314_v41  ;;  %v1096_v51 = vpop.f32.mrb[33].mxu1 }
 0x6f3   :  { %v1097_v53 = vadd.f32 %v1096_v51, %v2314_v41 }
 0x6f4   :  { %v1136_v36 = vmax.f32 %v1102_v34, 0.0 }
 0x6f5   :  { %v1135_v54 = vmax.f32 %v1097_v53, 0.0  ;;  %v1791_v55 = vpop.f32.mrb[34].mxu1 }
 0x6f6   :  { %v1112_v12 = vadd.f32 %v1791_v55, %v2314_v41  ;;  %v1106_v49 = vpop.f32.mrb[35].mxu1 }
 0x6f7   :  { %v1107_v52 = vadd.f32 %v1106_v49, %v2314_v41  ;;  %1814 = vmatprep.mubr.msk.f32.mxu1 %vm78_vm0, %v1135_v54 }
 0x6f8   :  { %1815 = vmatmul.mubr.msk.f32.vlgmr.msra.gmra.mrb[40].mxu1 %vm78_vm0, %v1136_v36  ;;  %v1138_v62 = vmax.f32 %v1112_v12, 0.0 }
 0x6f9   :  { %v1137_v61 = vmax.f32 %v1107_v52, 0.0  ;;  %v1794_v31 = vpop.f32.mrb[36].mxu1 }
 0x6fa   :  { %v1122_v0 = vadd.f32 %v1794_v31, %v2314_v41  ;;  %v1116_v38 = vpop.f32.mrb[37].mxu1 }
 0x6fb   :  { %v1117_v58 = vadd.f32 %v1116_v38, %v2314_v41  ;;  %1817 = vmatprep.mubr.msk.f32.mxu1 %vm78_vm0, %v1137_v61 }
 0x6fc   :  { %1818 = vmatmul.mubr.msk.f32.gmra.mrb[42].mxu1 %vm78_vm0, %v1138_v62  ;;  %v1140_v10 = vmax.f32 %v1122_v0, 0.0 }
 0x6fd   :  { %v1139_v7 = vmax.f32 %v1117_v58, 0.0  ;;  %v1797_v60 = vpop.f32.mrb[38].mxu1 }
 0x6fe   :  { %v1132_v8 = vadd.f32 %v1797_v60, %v2314_v41  ;;  %v1126_v40 = vpop.f32.mrb[39].mxu1 }
 0x6ff   :  { %v1127_v15 = vadd.f32 %v1126_v40, %v2314_v41  ;;  %1820 = vmatprep.mubr.msk.f32.mxu1 %vm78_vm0, %v1139_v7  ;;  %v869_v41 = vadd.f32 %v2499_v50, %v2356_v48 }
 0x700   :  { %1821 = vmatmul.mubr.msk.f32.gmra.mrb[44].mxu1 %vm78_vm0, %v1140_v10  ;;  %v1142_v2 = vmax.f32 %v1132_v8, 0.0 }
 0x701   :  { %v1141_v11 = vmax.f32 %v1127_v15, 0.0 }
 0x703   :  { %1823 = vmatprep.mubr.msk.f32.mxu1 %vm78_vm0, %v1141_v11 }
 0x704   :  { %1824 = vmatmul.mubr.msk.f32.gmra.mrb[46].mxu1 %vm78_vm0, %v1142_v2 }
 0x7cb   :  { %v1816_v13 = vpop.f32.mrb[40].mxu1 }
 0x7cc   :  { %v1239_v14 = vadd.f32 %v1816_v13, %v2345_v18  ;;  %v1233_v6 = vpop.f32.mrb[41].mxu1 }
 0x7cd   :  { %v1234_v19 = vadd.f32 %v1233_v6, %v2345_v18 }
 0x7ce   :  { %v1273_v21 = vadd.f32 %v1239_v14, %v870_v23 }
 0x7cf   :  { %v1272_v27 = vadd.f32 %v1234_v19, %v869_v41  ;;  %v1819_v5 = vpop.f32.mrb[42].mxu1 }
 0x7d0   :  { %v1282_v17 = vsel %vm67_vm1, %v1239_v14, %v1273_v21  ;;  %v1249_v22 = vadd.f32 %v1819_v5, %v2345_v18  ;;  %v1243_v25 = vpop.f32.mrb[43].mxu1 }
 0x7d1   :  { %1290 = vst [vmem:[%s2651_s5 + $0x8] sm:$0xff] %v1282_v17  ;;  %v1281_v48 = vsel %vm67_vm1, %v1234_v19, %v1272_v27  ;;  %v1244_v50 = vadd.f32 %v1243_v25, %v2345_v18 }
 0x7d2   :  { %1289 = vst [vmem:[%s2651_s5] sm:$0xff] %v1281_v48  ;;  %v1275_v42 = vadd.f32 %v1249_v22, %v872_v39 }
 0x7d3   :  { %v1274_v32 = vadd.f32 %v1244_v50, %v871_v26  ;;  %v1822_v30 = vpop.f32.mrb[44].mxu1 }
 0x7d4   :  { %v1284_v45 = vsel %vm67_vm1, %v1249_v22, %v1275_v42  ;;  %v1259_v44 = vadd.f32 %v1822_v30, %v2345_v18  ;;  %v1253_v20 = vpop.f32.mrb[45].mxu1 }
 0x7d5   :  { %1292 = vst [vmem:[%s2651_s5 + $0x18] sm:$0xff] %v1284_v45  ;;  %v1283_v24 = vsel %vm67_vm1, %v1244_v50, %v1274_v32  ;;  %v1254_v28 = vadd.f32 %v1253_v20, %v2345_v18 }
 0x7d6   :  { %1291 = vst [vmem:[%s2651_s5 + $0x10] sm:$0xff] %v1283_v24  ;;  %v1277_v56 = vadd.f32 %v1259_v44, %v874_v33 }
 0x7d7   :  { %v1276_v57 = vadd.f32 %v1254_v28, %v873_v47  ;;  %v1825_v46 = vpop.f32.mrb[46].mxu1 }
 0x7d8   :  { %v1286_v35 = vsel %vm67_vm1, %v1259_v44, %v1277_v56  ;;  %v1269_v59 = vadd.f32 %v1825_v46, %v2345_v18  ;;  %v1263_v43 = vpop.f32.mrb[47].mxu1 }
 0x7d9   :  { %1294 = vst [vmem:[%s2651_s5 + $0x28] sm:$0xff] %v1286_v35  ;;  %v1285_v63 = vsel %vm67_vm1, %v1254_v28, %v1276_v57  ;;  %v1264_v34 = vadd.f32 %v1263_v43, %v2345_v18 }
 0x7da   :  { %1293 = vst [vmem:[%s2651_s5 + $0x20] sm:$0xff] %v1285_v63  ;;  %v1279_v3 = vadd.f32 %v1269_v59, %v876_v29 }
 0x7db   :  { %v1278_v37 = vadd.f32 %v1264_v34, %v875_v9 }
 0x7dc   :  { %v1288_v51 = vsel %vm67_vm1, %v1269_v59, %v1279_v3 }
 0x7dd   :  { %1296 = vst [vmem:[%s2651_s5 + $0x38] sm:$0xff] %v1288_v51  ;;  %v1287_v1 = vsel %vm67_vm1, %v1264_v34, %v1278_v37 }
 0x7de   :  { %1295 = vst [vmem:[%s2651_s5 + $0x30] sm:$0xff] %v1287_v1 }

</bundles_post_ra>
